<compile_context>
chip_gen: v7x
topology: tpu7x:2x2x1
jax: 0.10.0
libtpu: 0.0.40
codegen_flags: <defaults>
</compile_context>

<pallas_src>
import functools

import jax
import jax.numpy as jnp
import numpy as np
from jax.experimental import pallas as pl
from jax.experimental.pallas import tpu as pltpu


def _greedy_ctc_kernel(em_ref, prev_ref, out_ref, *, blank):
    """One time tile of greedy CTC decode.

    out[0, t] = argmax_l emission[t, l]  if it starts a new run and is not blank
              = -1                       otherwise
    """
    tT, L = em_ref.shape

    em = em_ref[...]  # native dtype: equality against its own max is exact

    # torch.argmax-compatible (first occurrence of the max) over the lane axis.
    maxval = jnp.max(em, axis=-1, keepdims=True)                   # (tT, 1)
    lane = jax.lax.broadcasted_iota(jnp.int32, (tT, L), 1)         # label ids
    cand = jnp.where(em == maxval, lane, jnp.int32(L))
    idx_col = jnp.min(cand, axis=-1, keepdims=True)                # (tT, 1)
    # TODO(synk): an all-NaN row clamps to L-1; torch.argmax would return the
    # NaN position.  Pathological input only -- the clamp just guards indexing.
    idx_col = jnp.minimum(idx_col, jnp.int32(L - 1))

    # Lane-dense result row: transpose the tiny index column to (1, tT) (XLU;
    # the extended slot is otherwise idle -- no MXU work in this kernel).
    # Routed through f32 (values <= L-1, exact) for robust transpose lowering.
    idx = jnp.transpose(idx_col.astype(jnp.float32), (1, 0)).astype(jnp.int32)

    # Boundary previous index: argmax of the last timestep of the previous
    # tile.  prev_ref holds rows [i*tT-8, i*tT-1]; row 7 is timestep i*tT-1.
    # For the first tile there is no predecessor -> sentinel -1 (never matches).
    pe = prev_ref[7:8, :]                                          # (1, L)
    lane1 = jax.lax.broadcasted_iota(jnp.int32, (1, L), 1)
    pmax = jnp.max(pe, axis=-1, keepdims=True)
    pcand = jnp.where(pe == pmax, lane1, jnp.int32(L))
    prev0 = jnp.minimum(jnp.min(pcand, axis=-1, keepdims=True), jnp.int32(L - 1))
    prev0 = jnp.where(pl.program_id(0) == 0, jnp.int32(-1), prev0)  # (1, 1)

    # Previous index per timestep via a single lane roll (XLU):
    # rolled[0, t] == idx[0, t-1]; lane 0's wrapped value -> boundary index.
    rolled = pltpu.roll(idx, shift=1, axis=1)
    t_lane = jax.lax.broadcasted_iota(jnp.int32, (1, tT), 1)
    prev_idx = jnp.where(t_lane == 0, prev0, rolled)

    keep = jnp.logical_and(idx != prev_idx, idx != jnp.int32(blank))
    out_ref[...] = jnp.where(keep, idx, jnp.int32(-1))


def _round_up(x, m):
    return ((x + m - 1) // m) * m


def _choose_time_tile(T, itemsize, target_bytes=1 << 20):
    """Rows per tile: ~1 MiB of lane-padded input per pipeline buffer.

    The (tT, L) tile is lane-padded to 128 lanes in VMEM, so one buffer is
    ~tT * 128 * itemsize bytes.  >=512 rows is where tiled mem-bound kernels
    reach ~85% of HBM roofline; the multiple-of-128 rounding (done by the
    caller) also satisfies 8/16/32-row sublane packing for every dtype and
    keeps the (1, tT) output block lane-dense.
    """
    rows = max(512, target_bytes // (128 * max(1, itemsize)))
    return int(rows)


def _vmem_limit_bytes(tT, itemsize):
    cap = 64 << 20  # conservative default: v7x per-TensorCore VMEM
    try:
        info = pltpu.get_tpu_info()
        cap = int(getattr(info, "vmem_capacity_bytes", cap) or cap)
    except Exception:
        pass
    need = (2 * tT * 128 * itemsize       # double-buffered, lane-padded input tile
            + 2 * 8 * 128 * itemsize      # previous-row window (double-buffered)
            + 2 * 8 * tT * 4              # (1, tT) int32 output block, sublane-padded
            + tT * 128 * 8)               # headroom for int32 intermediates
    return int(min(max(need, 16 << 20), int(0.75 * cap)))


def greedy_ctc_indices(emission: jax.Array, blank: int = 0,
                       time_tile: int | None = None):
    """Device half of GreedyCTCDecoder.forward.

    Returns a (1, T_pad) int32 array; entry t (t < T) is the surviving label
    index at timestep t, or -1 if that timestep emits nothing.
    """
    T, L = emission.shape
    itemsize = jnp.dtype(emission.dtype).itemsize

    if time_tile is None:
        time_tile = _choose_time_tile(T, itemsize)
    # Multiple of 128 (lane-dense output block; also covers every dtype's
    # sublane packing), no larger than the 128-rounded sequence length.
    tT = max(128, (int(time_tile) // 128) * 128)
    tT = min(tT, _round_up(max(T, 1), 128))

    num_tiles = pl.cdiv(T, tT)
    T_pad = num_tiles * tT   # never materialized as padded input: the ragged
                             # tail is handled by Pallas' clamped block DMA and
                             # only [:T] of the output is read back.

    kernel = functools.partial(_greedy_ctc_kernel, blank=blank)
    prev_blocks = tT // 8    # prev-window index map works in 8-row block units

    cost = pl.CostEstimate(
        flops=6 * T_pad * L,
        transcendentals=0,
        bytes_accessed=T_pad * L * itemsize
        + num_tiles * 8 * L * itemsize
        + T_pad * 4,
    )

    return pl.pallas_call(
        kernel,
        grid=(num_tiles,),
        in_specs=[
            # Main (tT, L) time tile.
            pl.BlockSpec((tT, L), lambda i: (i, 0)),
            # Last 8 rows of the previous tile (row 7 == timestep i*tT - 1);
            # clamped to block 0 for i == 0, where the kernel ignores it.
            pl.BlockSpec((8, L), lambda i: (jnp.maximum(i * prev_blocks - 1, 0), 0)),
        ],
        out_specs=pl.BlockSpec((1, tT), lambda i: (0, i)),
        out_shape=jax.ShapeDtypeStruct((1, T_pad), jnp.int32),
        compiler_params=pltpu.CompilerParams(
            dimension_semantics=("parallel",),   # no cross-tile carry -> both
                                                 # v7x TensorCores share the grid
            vmem_limit_bytes=_vmem_limit_bytes(tT, itemsize),
        ),
        cost_estimate=cost,
    )(emission, emission)


def greedy_ctc_decode(emission: jax.Array, labels, blank: int = 0,
                      time_tile: int | None = None) -> str:
    """JAX/Pallas equivalent of GreedyCTCDecoder.forward."""
    T = emission.shape[0]
    packed = jax.block_until_ready(greedy_ctc_indices(emission, blank, time_tile))
    vals = np.asarray(jax.device_get(packed))[0, :T]
    # Host-side glue: label-index -> char mapping and ''.join (no device equiv).
    return "".join(labels[int(v)] for v in vals if v >= 0)


def _reference_decode(emission, labels, blank=0):
    """Pure-Python reference mirroring the PyTorch module semantics."""
    ind = np.asarray(jax.device_get(emission)).argmax(axis=-1).tolist()
    collapsed = [ind[0]] + [b for a, b in zip(ind[:-1], ind[1:]) if a != b]
    return "".join(labels[i] for i in collapsed if i != blank)


if __name__ == "__main__":
    # Label set: index 0 is the CTC blank ('-'), rest arbitrary characters.
    labels = "-|abcdefghijklmnopqrstuvwxyz'.,?"
    assert len(labels) == 32

    key = jax.random.PRNGKey(0)
    # T=200 timesteps, L=32 labels.  T is not a tile multiple, so the ragged
    # last tile (clamped DMA, no host padding) is exercised.
    emission = jax.random.normal(key, (200, 32), dtype=jnp.float32)
    expected = _reference_decode(emission, labels, blank=0)

    # Multi-tile path: exercises the cross-tile previous-row window.
    transcript_multi = greedy_ctc_decode(emission, labels, blank=0, time_tile=128)
    assert transcript_multi == expected, (transcript_multi, expected)

    # Default (single-tile) path.
    transcript_auto = greedy_ctc_decode(emission, labels, blank=0)
    assert transcript_auto == expected, (transcript_auto, expected)

    print("KERNEL_OK")
</pallas_src>

<mosaic_0001>
module attributes {stable_mosaic.version = 11 : i64} {
  func.func @_greedy_ctc_kernel(%arg0: i32, %arg1: memref<128x32xf32, #tpu.memory_space<vmem>>, %arg2: memref<8x32xf32, #tpu.memory_space<vmem>>, %arg3: memref<1x128xi32, #tpu.memory_space<vmem>>) attributes {dimension_semantics = [#tpu.dimension_semantics<parallel>], iteration_bounds = array<i64: 2>, scalar_prefetch = 0 : i64, scratch_operands = 0 : i64, tpu.core_type = #tpu.core_type<tc>, window_params = [{transform_indices = @transform_0, window_bounds = array<i64: 128, 32>}, {transform_indices = @transform_1, window_bounds = array<i64: 8, 32>}, {transform_indices = @transform_2, window_bounds = array<i64: 1, 128>}]} {
    %c0 = arith.constant 0 : index
    %c0_0 = arith.constant 0 : index
    %0 = vector.load %arg1[%c0, %c0_0] : memref<128x32xf32, #tpu.memory_space<vmem>>, vector<128x32xf32>
    %cst = arith.constant dense<0xFF800000> : vector<128xf32>
    %1 = vector.multi_reduction <maximumf>, %0, %cst [1] : vector<128x32xf32> to vector<128xf32>
    %2 = vector.shape_cast %1 : vector<128xf32> to vector<128x1xf32>
    %3 = tpu.iota {dimensions = array<i32: 1>} : vector<128x32xi32>
    %4 = vector.broadcast %2 : vector<128x1xf32> to vector<128x32xf32>
    %5 = arith.cmpf oeq, %0, %4 : vector<128x32xf32>
    %c32_i32 = arith.constant 32 : i32
    %6 = vector.broadcast %c32_i32 : i32 to vector<128x32xi32>
    %7 = arith.select %5, %3, %6 : vector<128x32xi1>, vector<128x32xi32>
    %cst_1 = arith.constant dense<2147483647> : vector<128xi32>
    %8 = vector.multi_reduction <minsi>, %7, %cst_1 [1] : vector<128x32xi32> to vector<128xi32>
    %9 = vector.shape_cast %8 : vector<128xi32> to vector<128x1xi32>
    %c31_i32 = arith.constant 31 : i32
    %10 = vector.broadcast %c31_i32 : i32 to vector<128x1xi32>
    %11 = arith.minsi %9, %10 : vector<128x1xi32>
    %12 = arith.sitofp %11 : vector<128x1xi32> to vector<128x1xf32>
    %13 = tpu.transpose %12, [1, 0] : vector<128x1xf32> -> vector<1x128xf32>
    %14 = arith.fptosi %13 : vector<1x128xf32> to vector<1x128xi32>
    %c7 = arith.constant 7 : index
    %c0_2 = arith.constant 0 : index
    %15 = vector.load %arg2[%c7, %c0_2] : memref<8x32xf32, #tpu.memory_space<vmem>>, vector<1x32xf32>
    %16 = tpu.iota {dimensions = array<i32: 1>} : vector<1x32xi32>
    %cst_3 = arith.constant dense<0xFF800000> : vector<1xf32>
    %17 = vector.multi_reduction <maximumf>, %15, %cst_3 [1] : vector<1x32xf32> to vector<1xf32>
    %18 = vector.shape_cast %17 : vector<1xf32> to vector<1x1xf32>
    %19 = vector.broadcast %18 : vector<1x1xf32> to vector<1x32xf32>
    %20 = arith.cmpf oeq, %15, %19 : vector<1x32xf32>
    %c32_i32_4 = arith.constant 32 : i32
    %21 = vector.broadcast %c32_i32_4 : i32 to vector<1x32xi32>
    %22 = arith.select %20, %16, %21 : vector<1x32xi1>, vector<1x32xi32>
    %cst_5 = arith.constant dense<2147483647> : vector<1xi32>
    %23 = vector.multi_reduction <minsi>, %22, %cst_5 [1] : vector<1x32xi32> to vector<1xi32>
    %24 = vector.shape_cast %23 : vector<1xi32> to vector<1x1xi32>
    %c31_i32_6 = arith.constant 31 : i32
    %25 = vector.broadcast %c31_i32_6 : i32 to vector<1x1xi32>
    %26 = arith.minsi %24, %25 : vector<1x1xi32>
    %c0_i32 = arith.constant 0 : i32
    %27 = arith.cmpi eq, %arg0, %c0_i32 : i32
    %c-1_i32 = arith.constant -1 : i32
    %28 = vector.broadcast %c-1_i32 : i32 to vector<1x1xi32>
    %29 = arith.select %27, %28, %26 : vector<1x1xi32>
    %c1_i32 = arith.constant 1 : i32
    %30 = tpu.dynamic_rotate %14 by %c1_i32 dim 1 : vector<1x128xi32>, i32 -> vector<1x128xi32>
    %31 = tpu.iota {dimensions = array<i32: 1>} : vector<1x128xi32>
    %c0_i32_7 = arith.constant 0 : i32
    %32 = vector.broadcast %c0_i32_7 : i32 to vector<1x128xi32>
    %33 = arith.cmpi eq, %31, %32 : vector<1x128xi32>
    %34 = vector.shape_cast %29 : vector<1x1xi32> to vector<1x1xi32>
    %35 = vector.broadcast %34 : vector<1x1xi32> to vector<1x128xi32>
    %36 = arith.select %33, %35, %30 : vector<1x128xi1>, vector<1x128xi32>
    %37 = arith.cmpi ne, %14, %36 : vector<1x128xi32>
    %c0_i32_8 = arith.constant 0 : i32
    %38 = vector.broadcast %c0_i32_8 : i32 to vector<1x128xi32>
    %39 = arith.cmpi ne, %14, %38 : vector<1x128xi32>
    %40 = arith.andi %37, %39 : vector<1x128xi1>
    %c-1_i32_9 = arith.constant -1 : i32
    %41 = vector.broadcast %c-1_i32_9 : i32 to vector<1x128xi32>
    %42 = arith.select %40, %14, %41 : vector<1x128xi1>, vector<1x128xi32>
    %c0_10 = arith.constant 0 : index
    %c0_11 = arith.constant 0 : index
    %43 = vector.load %arg3[%c0_10, %c0_11] : memref<1x128xi32, #tpu.memory_space<vmem>>, vector<1x128xi32>
    tpu.vector_store %arg3[%c0_10, %c0_11], %42 {strides = array<i32>} : memref<1x128xi32, #tpu.memory_space<vmem>>, vector<1x128xi32>,
    return
  }
  func.func @transform_0(%arg0: i32) -> (i32, i32) {
    %c0_i32 = arith.constant 0 : i32
    %c0_i32_0 = arith.constant 0 : i32
    return %arg0, %c0_i32 : i32, i32
  }
  func.func @transform_1(%arg0: i32) -> (i32, i32) {
    %c16_i32 = arith.constant 16 : i32
    %0 = arith.muli %arg0, %c16_i32 : i32
    %c1_i32 = arith.constant 1 : i32
    %1 = arith.subi %0, %c1_i32 : i32
    %c0_i32 = arith.constant 0 : i32
    %2 = arith.maxsi %1, %c0_i32 : i32
    %c0_i32_0 = arith.constant 0 : i32
    %c0_i32_1 = arith.constant 0 : i32
    return %2, %c0_i32_0 : i32, i32
  }
  func.func @transform_2(%arg0: i32) -> (i32, i32) {
    %c0_i32 = arith.constant 0 : i32
    %c0_i32_0 = arith.constant 0 : i32
    return %c0_i32, %arg0 : i32, i32
  }
}

</mosaic_0001>

<bundles_post_ra>
// kernel: tpu_custom_call.1
= control target key start
LH: loop header
LB: loop body
LE: loop exit
PB: predicated region body
PF: predicated region fallthrough
CT: control target
= control target key end

     0   :  { %7 = vsyncpa [#allocation3], 0  ;;  %s1343_s0 = inlined_call_operand.vmem [shape: f32[200,32], index: 0, kind: input, shape index: {}]   ;;  %s1344_s1 = inlined_call_operand.vmem [shape: f32[200,32], index: 1, kind: input, shape index: {}]   ;;  %s1345_s2 = inlined_call_operand.hbm [shape: s32[1,256], index: 2, kind: output, shape index: {}]  }
   0x1   :  { %9 = vsyncpa [#allocation3 + $0x1], 0  ;;  %s894_s9 = smov 0   ;;  %s896_s10 = smov 0  }
   0x2   :  { %s898_s11 = smov 0   ;;  %s900_s12 = smov 0  }
   0x3 LB: > { %s915_s13 = sadd.s32 4294967295, %s875_s12   ;;  %s746_s14 = sadd.s32 4294967294, %s875_s12   ;;  %s875_s12 = sphi %s900_s12, %s1351_s12   ;;  %s871_s11 = sphi %s898_s11, %s1350_s11   ;;  %s867_s10 = sphi %s896_s10, %s1349_s10   ;;  %s863_s9 = sphi %s894_s9, %s1348_s9  }
   0x4   : > { %s919_s15 = sadd.s32 1, %s875_s12   ;;  %s82_s16 = sadd.s32 1, %s871_s11 }
   0x5   : > { %s79_s17 = ssub.s32 %s875_s12, %s919_s15  ;;  %p92_p0 = scmp.ne.s32.totalorder %s871_s11, %s867_s10 }
   0x6   : > { %p80_p1 = scmp.eq.s32.totalorder %s79_s17, 0  ;;  %p93_p2 = scmp.eq.s32.totalorder %s915_s13, 1 }
   0x7   : > { %p98_p3 = scmp.ne.s32.totalorder %s867_s10, %s863_s9  ;;  %p99_p4 = scmp.eq.s32.totalorder %s746_s14, 1 }
   0x8   : > { %s930_s18 = scalar_select %p80_p1, %s871_s11, %s82_s16  }
   0x9   : > { %p932_p5 = por %p93_p2, %p92_p0  ;;  %p936_p6 = por %p99_p4, %p98_p3 }
   0xa   : > { %p753_p7 = scmp.ge.s32.totalorder %s875_s12, 1  ;;  %p149_p8 = scmp.lt.s32.totalorder %s875_s12, 3 }
   0xc   : > { %p150_p9 = pnand %p753_p7, %p149_p8 }
   0xd   : > { %s943_s21 = sshll.u32 (!%p150_p9), %s915_s13, 4  ;;  %vm224_vm0 = vcmask (!%p150_p9), 261120   ;;  %v273_v32 = vlaneseq (!%p150_p9)  ;;  %s877_s5 = smov (!%p150_p9), 1  }
   0xe   : > { %153 = sbr.rel (%p150_p9) target bundleno = 736 (0x2e0), region = 28  ;;  %p187_p10 = scmp.lt.s32.totalorder (!%p150_p9), %s943_s21, 24 }
   0xf   : > { %v1023_v33 = vand.u32 (!%p150_p9), 127, %v273_v32  ;;  %s1070_s27 = sadd.s32 (!%p150_p9), 4294967295, %s943_s21  ;;  %p652_p13 = scmp.eq.s32.totalorder (!%p150_p9), %s915_s13, 0 }
  0x10   : > { %p198_p11 = scmp.gt.s32.totalorder (!%p150_p9), %s1070_s27, 0  ;;  %p758_p12 = scmp.lt.s32.totalorder (!%p150_p9), %s1070_s27, 24 }
  0x11   : > { %s180_s7 = sand.u32 (!%p150_p9), 1, %s867_s10   ;;  %s1301_s17 = scalar_lea.hbm (!%p150_p9), %s1345_s2, %s943_s21 }
  0x12   : > { %s181_s8 = scalar_lea.vmem (!%p150_p9), [#allocation2], %s180_s7  ;;  %s878_s24 = smov (!%p150_p9), [#allocation2]  }
  0x13   : > { %s679_s14 = sshll.u32 (!%p150_p9), %s181_s8, 4  ;;  %s817_s25 = sshll.u32 (!%p150_p9), %s878_s24, 4  ;;  %s1303_s14 = int_to_ptr.vmem [resolvable:$true] %s679_s14  ;;  %s818_s25 = int_to_ptr.vmem [resolvable:$false] %s817_s25 }
  0x14   : > { %p820_p3 = scmp.lt.s32.totalorder (!%p150_p9), %s1303_s14, %s818_s25 }
  0x15   : > { %s188_s22 = scalar_select %p187_p10, %s943_s21, 24 }
  0x16   : > { %s199_s28 = scalar_select %p198_p11, %s1070_s27, 0 }
  0x17   : > { %s755_s23 = sshll.u32 %s188_s22, 3  ;;  %s667_s22 = scalar_lea.sflag [#allocation3], %s180_s7 }
  0x18   : > { %s950_s26 = scalar_lea.vmem %s1343_s0, %s755_s23  ;;  %s1353_s28 = smov (!%p758_p12, %s199_s28), 24 }
  0x19   : > { %v208_v0 = vld [vmem:[%s950_s26] sm:$0xff]  ;;  %v210_v1 = vld [vmem:[%s950_s26 + $0x10] sm:$0xff]  ;;  %v955_v2 = vld [vmem:[%s950_s26 + $0x8] sm:$0xff]  ;;  %s763_s29 = sshll.u32 %s1353_s28, 3  ;;  %s813_s23 = scalar_lea.vmem %s1303_s14, 16 }
  0x1a   : > { %v225_v3 = vsel %vm224_vm0, %v208_v0, -inf  ;;  %v231_v4 = vsel %vm224_vm0, %v210_v1, -inf  ;;  %v211_v5 = vld [vmem:[%s950_s26 + $0x18] sm:$0xff]  ;;  %v228_v6 = vsel %vm224_vm0, %v955_v2, -inf  ;;  %v964_v8 = vld [vmem:[%s950_s26 + $0x20] sm:$0xff]  ;;  %v967_v9 = vld [vmem:[%s950_s26 + $0x28] sm:$0xff]  ;;  %s203_s4 = scalar_lea.vmem %s1344_s1, %s763_s29  ;;  %p814_p0 = scmp.ne.s32.totalorder %s1303_s14, %s813_s23 }
  0x1b   : > { %226 = vmax.xlane.f32.xlu0 %v225_v3  ;;  %232 = vmax.xlane.f32.xlu1 %v231_v4  ;;  %v234_v7 = vsel %vm224_vm0, %v211_v5, -inf  ;;  %v237_v10 = vsel %vm224_vm0, %v964_v8, -inf  ;;  %v240_v11 = vsel %vm224_vm0, %v967_v9, -inf  ;;  %v974_v12 = vld [vmem:[%s950_s26 + $0x30] sm:$0xff]  ;;  %v977_v13 = vld [vmem:[%s950_s26 + $0x38] sm:$0xff]  ;;  %v984_v16 = vld [vmem:[%s950_s26 + $0x40] sm:$0xff] }
  0x1c   : > { %v243_v14 = vsel %vm224_vm0, %v974_v12, -inf  ;;  %v246_v15 = vsel %vm224_vm0, %v977_v13, -inf  ;;  %v987_v17 = vld [vmem:[%s950_s26 + $0x48] sm:$0xff]  ;;  %v249_v18 = vsel %vm224_vm0, %v984_v16, -inf  ;;  %v994_v20 = vld [vmem:[%s950_s26 + $0x50] sm:$0xff]  ;;  %v997_v21 = vld [vmem:[%s950_s26 + $0x58] sm:$0xff]  ;;  %p815_p1 = pnand %p814_p0, %p932_p5 }
  0x1d   : > { %v252_v19 = vsel %vm224_vm0, %v987_v17, -inf  ;;  %v255_v22 = vsel %vm224_vm0, %v994_v20, -inf  ;;  %v258_v23 = vsel %vm224_vm0, %v997_v21, -inf  ;;  %v1004_v24 = vld [vmem:[%s950_s26 + $0x60] sm:$0xff]  ;;  %v1007_v25 = vld [vmem:[%s950_s26 + $0x68] sm:$0xff]  ;;  %v1014_v28 = vld [vmem:[%s950_s26 + $0x70] sm:$0xff] }
  0x1e   : > { %v261_v26 = vsel %vm224_vm0, %v1004_v24, -inf  ;;  %v264_v27 = vsel %vm224_vm0, %v1007_v25, -inf  ;;  %v1017_v29 = vld [vmem:[%s950_s26 + $0x78] sm:$0xff]  ;;  %v267_v30 = vsel %vm224_vm0, %v1014_v28, -inf  ;;  %s653_s6 = scalar_select %p652_p13, 1, 0 }
  0x1f   : > { %229 = vmax.xlane.f32.xlu0 %v228_v6  ;;  %235 = vmax.xlane.f32.xlu1 %v234_v7  ;;  %v270_v31 = vsel %vm224_vm0, %v1017_v29, -inf  ;;  %p816_p2 = pneg %p815_p1  ;;  %s819_s26 = scalar_lea.vmem %s818_s25, 32 }
  0x20   : > { %p821_p4 = scmp.lt.s32.totalorder %s819_s26, %s813_s23 }
  0x22   : > { %p822_p7 = por %p821_p4, %p820_p3 }
  0x23   : > { %238 = vmax.xlane.f32.xlu0 %v237_v10  ;;  %241 = vmax.xlane.f32.xlu1 %v240_v11 }
  0x24   : > { %p823_p8 = pnand %p822_p7, %p816_p2 }
  0x27   : > { %244 = vmax.xlane.f32.xlu0 %v243_v14  ;;  %247 = vmax.xlane.f32.xlu1 %v246_v15 }
  0x2b   : > { %250 = vmax.xlane.f32.xlu0 %v249_v18  ;;  %253 = vmax.xlane.f32.xlu1 %v252_v19 }
  0x2f   : > { %256 = vmax.xlane.f32.xlu0 %v255_v22  ;;  %259 = vmax.xlane.f32.xlu1 %v258_v23 }
  0x33   : > { %262 = vmax.xlane.f32.xlu0 %v261_v26  ;;  %265 = vmax.xlane.f32.xlu1 %v264_v27 }
  0x37   : > { %268 = vmax.xlane.f32.xlu0 %v267_v30  ;;  %271 = vmax.xlane.f32.xlu1 %v270_v31 }
  0xa8   : > { %v227_v34 = vpop.xlane.xlu0 %226  ;;  %v233_v35 = vpop.xlane.xlu1 %232 }
  0xa9   : > { %vm275_vm1 = vcmp.eq.f32.partialorder %v208_v0, %v227_v34  ;;  %vm277_vm2 = vcmp.eq.f32.partialorder %v210_v1, %v233_v35 }
  0xaa   : > { %v291_v36 = vsel %vm275_vm1, %v1023_v33, 32  ;;  %v293_v37 = vsel %vm277_vm2, %v1023_v33, 32 }
  0xab   : > { %v1028_v38 = vsel %vm224_vm0, %v291_v36, 2147483647  ;;  %v1031_v39 = vsel %vm224_vm0, %v293_v37, 2147483647 }
  0xac   : > { %v230_v40 = vpop.xlane.xlu0 %229  ;;  %v236_v41 = vpop.xlane.xlu1 %235  ;;  %v309_v42 = vshra.s32 %v1028_v38, 16  ;;  %v339_v43 = vshra.s32 %v1031_v39, 16 }
  0xad   : > { %vm276_vm3 = vcmp.eq.f32.partialorder %v955_v2, %v230_v40  ;;  %vm278_vm4 = vcmp.eq.f32.partialorder %v211_v5, %v236_v41 }
  0xae   : > { %v292_v44 = vsel %vm276_vm3, %v1023_v33, 32  ;;  %v294_v45 = vsel %vm278_vm4, %v1023_v33, 32  ;;  %v1038_v46 = vcvt.s32.f32 %v309_v42  ;;  %v1047_v51 = vcvt.s32.f32 %v339_v43 }
  0xaf   : > { %v1041_v47 = vsel %vm224_vm0, %v292_v44, 2147483647  ;;  %v1044_v48 = vsel %vm224_vm0, %v294_v45, 2147483647 }
  0xb0   : > { %312 = vmin.xlane.f32.xlu0 %v1038_v46  ;;  %v239_v49 = vpop.xlane.xlu0 %238  ;;  %v242_v50 = vpop.xlane.xlu1 %241  ;;  %v324_v52 = vshra.s32 %v1041_v47, 16  ;;  %v354_v53 = vshra.s32 %v1044_v48, 16 }
  0xb1   : > { %vm279_vm5 = vcmp.eq.f32.partialorder %v964_v8, %v239_v49  ;;  %vm280_vm6 = vcmp.eq.f32.partialorder %v967_v9, %v242_v50 }
  0xb2   : > { %v295_v54 = vsel %vm279_vm5, %v1023_v33, 32  ;;  %v296_v55 = vsel %vm280_vm6, %v1023_v33, 32  ;;  %v1055_v56 = vcvt.s32.f32 %v324_v52  ;;  %v1065_v61 = vcvt.s32.f32 %v354_v53 }
  0xb3   : > { %v1058_v57 = vsel %vm224_vm0, %v295_v54, 2147483647  ;;  %v1061_v58 = vsel %vm224_vm0, %v296_v55, 2147483647 }
  0xb4   : > { %342 = vmin.xlane.f32.xlu0 %v1047_v51  ;;  %327 = vmin.xlane.f32.xlu1 %v1055_v56  ;;  %v245_v59 = vpop.xlane.xlu0 %244  ;;  %v248_v60 = vpop.xlane.xlu1 %247  ;;  %v369_v62 = vshra.s32 %v1058_v57, 16  ;;  %v384_v63 = vshra.s32 %v1061_v58, 16 }
  0xb5   : > { %vm281_vm7 = vcmp.eq.f32.partialorder %v974_v12, %v245_v59  ;;  %vm282_vm8 = vcmp.eq.f32.partialorder %v977_v13, %v248_v60  ;;  %v1174_v59 = vld [vmem:[%s203_s4 + $0x7] sm:$0x1] }
  0xb6   : > { %v297_v0 = vsel %vm281_vm7, %v1023_v33, 32  ;;  %v298_v1 = vsel %vm282_vm8, %v1023_v33, 32  ;;  %v1076_v2 = vcvt.s32.f32 %v369_v62  ;;  %v1087_v7 = vcvt.s32.f32 %v384_v63 }
  0xb7   : > { %v1079_v3 = vsel %vm224_vm0, %v297_v0, 2147483647  ;;  %v1082_v4 = vsel %vm224_vm0, %v298_v1, 2147483647  ;;  %v308_v63 = vand.u32 65535, %v1028_v38  ;;  %v353_v38 = vand.u32 65535, %v1044_v48 }
  0xb8   : > { %357 = vmin.xlane.f32.xlu1 %v1065_v61  ;;  %372 = vmin.xlane.f32.xlu0 %v1076_v2  ;;  %v251_v5 = vpop.xlane.xlu0 %250  ;;  %v254_v6 = vpop.xlane.xlu1 %253  ;;  %v399_v8 = vshra.s32 %v1079_v3, 16  ;;  %v414_v9 = vshra.s32 %v1082_v4, 16  ;;  %v383_v48 = vand.u32 65535, %v1061_v58  ;;  %v413_v58 = vand.u32 65535, %v1082_v4 }
  0xb9   : > { %vm283_vm9 = vcmp.eq.f32.partialorder %v984_v16, %v251_v5  ;;  %vm284_vm10 = vcmp.eq.f32.partialorder %v987_v17, %v254_v6  ;;  %v310_v1 = vcvt.s32.f32 %v308_v63  ;;  %v323_v5 = vand.u32 65535, %v1041_v47 }
  0xba   : > { %v299_v10 = vsel %vm283_vm9, %v1023_v33, 32  ;;  %v300_v11 = vsel %vm284_vm10, %v1023_v33, 32  ;;  %v1095_v12 = vcvt.s32.f32 %v399_v8  ;;  %v1108_v17 = vcvt.s32.f32 %v414_v9 }
  0xbb   : > { %v1098_v13 = vsel %vm224_vm0, %v299_v10, 2147483647  ;;  %v1101_v14 = vsel %vm224_vm0, %v300_v11, 2147483647  ;;  %v338_v6 = vand.u32 65535, %v1031_v39  ;;  %v325_v11 = vcvt.s32.f32 %v323_v5 }
  0xbc   : > { %387 = vmin.xlane.f32.xlu1 %v1087_v7  ;;  %402 = vmin.xlane.f32.xlu0 %v1095_v12  ;;  %v257_v15 = vpop.xlane.xlu0 %256  ;;  %v260_v16 = vpop.xlane.xlu1 %259  ;;  %v429_v18 = vshra.s32 %v1098_v13, 16  ;;  %v444_v19 = vshra.s32 %v1101_v14, 16  ;;  %v443_v4 = vand.u32 65535, %v1101_v14 }
  0xbd   : > { %vm285_vm11 = vcmp.eq.f32.partialorder %v994_v20, %v257_v15  ;;  %vm286_vm12 = vcmp.eq.f32.partialorder %v997_v21, %v260_v16  ;;  %v340_v15 = vcvt.s32.f32 %v338_v6  ;;  %v368_v16 = vand.u32 65535, %v1058_v57 }
  0xbe   : > { %v301_v22 = vsel %vm285_vm11, %v1023_v33, 32  ;;  %v302_v23 = vsel %vm286_vm12, %v1023_v33, 32  ;;  %v1117_v26 = vcvt.s32.f32 %v429_v18  ;;  %v1127_v32 = vcvt.s32.f32 %v444_v19 }
  0xbf   : > { %v1120_v27 = vsel %vm224_vm0, %v301_v22, 2147483647  ;;  %v1123_v30 = vsel %vm224_vm0, %v302_v23, 2147483647  ;;  %v355_v19 = vcvt.s32.f32 %v353_v38  ;;  %v370_v22 = vcvt.s32.f32 %v368_v16 }
  0xc0   : > { %417 = vmin.xlane.f32.xlu1 %v1108_v17  ;;  %432 = vmin.xlane.f32.xlu0 %v1117_v26  ;;  %v263_v31 = vpop.xlane.xlu0 %262  ;;  %v266_v20 = vpop.xlane.xlu1 %265  ;;  %v459_v21 = vshra.s32 %v1120_v27, 16  ;;  %v474_v34 = vshra.s32 %v1123_v30, 16  ;;  %v398_v57 = vand.u32 65535, %v1079_v3  ;;  %v428_v3 = vand.u32 65535, %v1098_v13 }
  0xc1   : > { %vm287_vm13 = vcmp.eq.f32.partialorder %v1004_v24, %v263_v31  ;;  %vm288_vm14 = vcmp.eq.f32.partialorder %v1007_v25, %v266_v20  ;;  %v385_v20 = vcvt.s32.f32 %v383_v48  ;;  %v458_v13 = vand.u32 65535, %v1120_v27 }
  0xc2   : > { %v303_v35 = vsel %vm287_vm13, %v1023_v33, 32  ;;  %v304_v36 = vsel %vm288_vm14, %v1023_v33, 32  ;;  %v1137_v37 = vcvt.s32.f32 %v459_v21  ;;  %v1147_v43 = vcvt.s32.f32 %v474_v34 }
  0xc3   : > { %v1140_v40 = vsel %vm224_vm0, %v303_v35, 2147483647  ;;  %v1143_v41 = vsel %vm224_vm0, %v304_v36, 2147483647  ;;  %v400_v21 = vcvt.s32.f32 %v398_v57  ;;  %v415_v36 = vcvt.s32.f32 %v413_v58 }
  0xc4   : > { %447 = vmin.xlane.f32.xlu1 %v1127_v32  ;;  %462 = vmin.xlane.f32.xlu0 %v1137_v37  ;;  %v269_v42 = vpop.xlane.xlu0 %268  ;;  %v272_v24 = vpop.xlane.xlu1 %271  ;;  %v489_v25 = vshra.s32 %v1140_v40, 16  ;;  %v504_v44 = vshra.s32 %v1143_v41, 16  ;;  %v473_v14 = vand.u32 65535, %v1123_v30  ;;  %v488_v27 = vand.u32 65535, %v1140_v40 }
  0xc5   : > { %vm289_vm15 = vcmp.eq.f32.partialorder %v1014_v28, %v269_v42  ;;  %vm290_vm1 = vcmp.eq.f32.partialorder %v1017_v29, %v272_v24  ;;  %v430_v42 = vcvt.s32.f32 %v428_v3  ;;  %v503_v30 = vand.u32 65535, %v1143_v41 }
  0xc6   : > { %v305_v45 = vsel %vm289_vm15, %v1023_v33, 32  ;;  %v306_v49 = vsel %vm290_vm1, %v1023_v33, 32  ;;  %v1155_v50 = vcvt.s32.f32 %v489_v25  ;;  %v1168_v28 = vcvt.s32.f32 %v504_v44 }
  0xc7   : > { %v1158_v52 = vsel %vm224_vm0, %v305_v45, 2147483647  ;;  %v1161_v53 = vsel %vm224_vm0, %v306_v49, 2147483647  ;;  %vm629_vm0 = vcmask 253952   ;;  %v445_v44 = vcvt.s32.f32 %v443_v4 }
  0xc8   : > { %477 = vmin.xlane.f32.xlu1 %v1147_v43  ;;  %492 = vmin.xlane.f32.xlu0 %v1155_v50  ;;  %v519_v29 = vshra.s32 %v1158_v52, 16  ;;  %v534_v54 = vshra.s32 %v1161_v53, 16  ;;  %v630_v62 = vsel %vm629_vm0, %v1174_v59, -inf  ;;  %v460_v45 = vcvt.s32.f32 %v458_v13 }
  0xc9   : > { %v518_v40 = vand.u32 65535, %v1158_v52  ;;  %v505_v5 = vcvt.s32.f32 %v503_v30  ;;  %v533_v41 = vand.u32 65535, %v1161_v53 }
  0xca   : > { %v1172_v55 = vcvt.s32.f32 %v519_v29  ;;  %v1178_v60 = vcvt.s32.f32 %v534_v54  ;;  %v475_v54 = vcvt.s32.f32 %v473_v14 }
  0xcb   : > { %v520_v6 = vcvt.s32.f32 %v518_v40 }
  0xcc   : > { %507 = vmin.xlane.f32.xlu1 %v1168_v28  ;;  %522 = vmin.xlane.f32.xlu0 %v1172_v55 }
  0xd0   : > { %537 = vmin.xlane.f32.xlu1 %v1178_v60  ;;  %631 = vmax.xlane.f32.xlu0 %v630_v62  ;;  %v490_v62 = vcvt.s32.f32 %v488_v27 }
 0x13d   : > { %v1184_v0 = vpop.xlane.xlu0 %312 }
 0x13e   : > { %vm314_vm2 = vcmp.eq.f32.partialorder %v1038_v46, %v1184_v0  ;;  %v319_v16 = vcvt.f32.s32 %v1184_v0 }
 0x13f   : > { %v315_v8 = vsel %vm314_vm2, %v310_v1, inf }
 0x140   : > { %316 = vmin.xlane.f32.xlu1 %v315_v8 }
 0x141   : > { %v1190_v9 = vpop.xlane.xlu1 %327  ;;  %v1192_v10 = vpop.xlane.xlu0 %342 }
 0x142   : > { %vm329_vm3 = vcmp.eq.f32.partialorder %v1055_v56, %v1190_v9  ;;  %vm344_vm4 = vcmp.eq.f32.partialorder %v1047_v51, %v1192_v10 }
 0x143   : > { %v330_v39 = vsel %vm329_vm3, %v325_v11, inf  ;;  %v345_v46 = vsel %vm344_vm4, %v340_v15, inf  ;;  %v535_v11 = vcvt.s32.f32 %v533_v41 }
 0x144   : > { %331 = vmin.xlane.f32.xlu0 %v330_v39  ;;  %346 = vmin.xlane.f32.xlu1 %v345_v46  ;;  %v320_v46 = vshll.u32 %v319_v16, 16 }
 0x145   : > { %v1200_v47 = vpop.xlane.xlu1 %357  ;;  %v1202_v18 = vpop.xlane.xlu0 %372 }
 0x146   : > { %vm359_vm5 = vcmp.eq.f32.partialorder %v1065_v61, %v1200_v47  ;;  %vm374_vm6 = vcmp.eq.f32.partialorder %v1076_v2, %v1202_v18  ;;  %v364_v57 = vcvt.f32.s32 %v1200_v47  ;;  %v379_v0 = vcvt.f32.s32 %v1202_v18 }
 0x147   : > { %v360_v51 = vsel %vm359_vm5, %v355_v19, inf  ;;  %v375_v56 = vsel %vm374_vm6, %v370_v22, inf }
 0x148   : > { %361 = vmin.xlane.f32.xlu0 %v360_v51  ;;  %376 = vmin.xlane.f32.xlu1 %v375_v56 }
 0x149   : > { %v1210_v23 = vpop.xlane.xlu1 %387  ;;  %v1212_v31 = vpop.xlane.xlu0 %402 }
 0x14a   : > { %vm389_vm7 = vcmp.eq.f32.partialorder %v1087_v7, %v1210_v23  ;;  %vm404_vm8 = vcmp.eq.f32.partialorder %v1095_v12, %v1212_v31 }
 0x14b   : > { %v390_v61 = vsel %vm389_vm7, %v385_v20, inf  ;;  %v405_v2 = vsel %vm404_vm8, %v400_v21, inf }
 0x14c   : > { %391 = vmin.xlane.f32.xlu0 %v390_v61  ;;  %406 = vmin.xlane.f32.xlu1 %v405_v2 }
 0x14d   : > { %v1220_v34 = vpop.xlane.xlu1 %417  ;;  %v1222_v35 = vpop.xlane.xlu0 %432 }
 0x14e   : > { %vm419_vm9 = vcmp.eq.f32.partialorder %v1108_v17, %v1220_v34  ;;  %vm434_vm10 = vcmp.eq.f32.partialorder %v1117_v26, %v1222_v35  ;;  %v424_v41 = vcvt.f32.s32 %v1220_v34 }
 0x14f   : > { %v420_v7 = vsel %vm419_vm9, %v415_v36, inf  ;;  %v435_v12 = vsel %vm434_vm10, %v430_v42, inf  ;;  %v365_v36 = vshll.u32 %v364_v57, 16 }
 0x150   : > { %421 = vmin.xlane.f32.xlu0 %v420_v7  ;;  %436 = vmin.xlane.f32.xlu1 %v435_v12  ;;  %v380_v7 = vshll.u32 %v379_v0, 16  ;;  %v394_v12 = vcvt.f32.s32 %v1210_v23 }
 0x151   : > { %v1230_v24 = vpop.xlane.xlu1 %447  ;;  %v1232_v25 = vpop.xlane.xlu0 %462 }
 0x152   : > { %vm449_vm11 = vcmp.eq.f32.partialorder %v1127_v32, %v1230_v24  ;;  %vm464_vm12 = vcmp.eq.f32.partialorder %v1137_v37, %v1232_v25  ;;  %v454_v34 = vcvt.f32.s32 %v1230_v24 }
 0x153   : > { %v450_v17 = vsel %vm449_vm11, %v445_v44, inf  ;;  %v465_v26 = vsel %vm464_vm12, %v460_v45, inf }
 0x154   : > { %451 = vmin.xlane.f32.xlu0 %v450_v17  ;;  %466 = vmin.xlane.f32.xlu1 %v465_v26 }
 0x155   : > { %v1240_v49 = vpop.xlane.xlu1 %477  ;;  %v1242_v29 = vpop.xlane.xlu0 %492 }
 0x156   : > { %vm479_vm13 = vcmp.eq.f32.partialorder %v1147_v43, %v1240_v49  ;;  %vm494_vm14 = vcmp.eq.f32.partialorder %v1155_v50, %v1242_v29 }
 0x157   : > { %v480_v32 = vsel %vm479_vm13, %v475_v54, inf  ;;  %v495_v37 = vsel %vm494_vm14, %v490_v62, inf  ;;  %v395_v54 = vshll.u32 %v394_v12, 16  ;;  %v409_v62 = vcvt.f32.s32 %v1212_v31 }
 0x158   : > { %481 = vmin.xlane.f32.xlu0 %v480_v32  ;;  %496 = vmin.xlane.f32.xlu1 %v495_v37  ;;  %v439_v31 = vcvt.f32.s32 %v1222_v35  ;;  %v469_v35 = vcvt.f32.s32 %v1232_v25 }
 0x159   : > { %v1250_v63 = vpop.xlane.xlu1 %507  ;;  %v1252_v1 = vpop.xlane.xlu0 %522 }
 0x15a   : > { %vm509_vm15 = vcmp.eq.f32.partialorder %v1168_v28, %v1250_v63  ;;  %vm524_vm1 = vcmp.eq.f32.partialorder %v1172_v55, %v1252_v1 }
 0x15b   : > { %v510_v43 = vsel %vm509_vm15, %v505_v5, inf  ;;  %v525_v50 = vsel %vm524_vm1, %v520_v6, inf  ;;  %v410_v6 = vshll.u32 %v409_v62, 16 }
 0x15c   : > { %511 = vmin.xlane.f32.xlu0 %v510_v43  ;;  %526 = vmin.xlane.f32.xlu1 %v525_v50 }
 0x15d   : > { %v1259_v52 = vpop.xlane.xlu1 %537  ;;  %v632_v8 = vpop.xlane.xlu0 %631 }
 0x15e   : > { %vm633_vm2 = vcmp.eq.f32.partialorder %v1174_v59, %v632_v8  ;;  %vm539_vm3 = vcmp.eq.f32.partialorder %v1178_v60, %v1259_v52  ;;  %v334_v59 = vcvt.f32.s32 %v1190_v9  ;;  %v349_v60 = vcvt.f32.s32 %v1192_v10 }
 0x15f   : > { %v634_v53 = vsel %vm633_vm2, %v1023_v33, 32  ;;  %v540_v15 = vsel %vm539_vm3, %v535_v11, inf }
 0x160   : > { %v1266_v28 = vsel %vm629_vm0, %v634_v53, 2147483647  ;;  %541 = vmin.xlane.f32.xlu0 %v540_v15  ;;  %v335_v48 = vshll.u32 %v334_v59, 16  ;;  %v350_v20 = vshll.u32 %v349_v60, 16  ;;  %v425_v15 = vshll.u32 %v424_v41, 16 }
 0x161   : > { %v637_v55 = vshra.s32 %v1266_v28, 16  ;;  %v440_v60 = vshll.u32 %v439_v31, 16 }
 0x163   : > { %v1269_v38 = vcvt.s32.f32 %v637_v55 }
 0x165   : > { %640 = vmin.xlane.f32.xlu1 %v1269_v38 }
 0x1cd   : > { %v317_v39 = vpop.xlane.xlu1 %316 }
 0x1ce   : > { %v318_v19 = vcvt.f32.s32 %v317_v39 }
 0x1d0   : > { %v321_v22 = vadd.s32 %v320_v46, %v318_v19 }
 0x1d1   : > { %v347_v51 = vpop.xlane.xlu1 %346  ;;  %v332_v56 = vpop.xlane.xlu0 %331 }
 0x1d2   : > { %v348_v21 = vcvt.f32.s32 %v347_v51  ;;  %v333_v58 = vcvt.f32.s32 %v332_v56  ;;  %vm547_vm0 = vcmp.lt.s32.totalorder %v321_v22, 31  ;;  %v455_v56 = vshll.u32 %v454_v34, 16 }
 0x1d3   : > { %v548_v3 = vsel %vm547_vm0, %v321_v22, 31 }
 0x1d4   : > { %v351_v61 = vadd.s32 %v350_v20, %v348_v21  ;;  %v336_v9 = vadd.s32 %v335_v48, %v333_v58  ;;  %v579_v2 = vcvt.s32.f32 %v548_v3 }
 0x1d5   : > { %v377_v42 = vpop.xlane.xlu1 %376  ;;  %v362_v10 = vpop.xlane.xlu0 %361 }
 0x1d6   : > { %vm551_vm4 = vcmp.lt.s32.totalorder %v351_v61, 31  ;;  %vm549_vm5 = vcmp.lt.s32.totalorder %v336_v9, 31  ;;  %v378_v4 = vcvt.f32.s32 %v377_v42  ;;  %v363_v13 = vcvt.f32.s32 %v362_v10  ;;  %595 = vxpose.xlu0.b32.start [1/16] (narrow) %v579_v2, 8 }
 0x1d7   : > { %v550_v47 = vsel %vm549_vm5, %v336_v9, 31  ;;  %v552_v18 = vsel %vm551_vm4, %v351_v61, 31  ;;  %v636_v61 = vand.u32 65535, %v1266_v28  ;;  %v470_v9 = vshll.u32 %v469_v35, 16 }
 0x1d8   : > { %v366_v44 = vadd.s32 %v365_v36, %v363_v13  ;;  %v580_v45 = vcvt.s32.f32 %v550_v47  ;;  %v381_v17 = vadd.s32 %v380_v7, %v378_v4  ;;  %v581_v30 = vcvt.s32.f32 %v552_v18 }
 0x1d9   : > { %v407_v14 = vpop.xlane.xlu1 %406  ;;  %v392_v27 = vpop.xlane.xlu0 %391  ;;  %v484_v2 = vcvt.f32.s32 %v1240_v49  ;;  %v638_v25 = vcvt.s32.f32 %v636_v61  ;;  %v499_v7 = vcvt.f32.s32 %v1242_v29  ;;  %v514_v18 = vcvt.f32.s32 %v1250_v63 }
 0x1da   : > { %vm553_vm6 = vcmp.lt.s32.totalorder %v366_v44, 31  ;;  %v393_v26 = vcvt.f32.s32 %v392_v27  ;;  %596 = vxpose.xlu0.b32.cont [2/16] (narrow) %v580_v45, 8  ;;  %vm555_vm7 = vcmp.lt.s32.totalorder %v381_v17, 31  ;;  %v408_v37 = vcvt.f32.s32 %v407_v14 }
 0x1db   : > { %v554_v32 = vsel %vm553_vm6, %v366_v44, 31  ;;  %v556_v50 = vsel %vm555_vm7, %v381_v17, 31  ;;  %v485_v47 = vshll.u32 %v484_v2, 16  ;;  %v500_v27 = vshll.u32 %v499_v7, 16 }
 0x1dc   : > { %v396_v5 = vadd.s32 %v395_v54, %v393_v26  ;;  %v582_v43 = vcvt.s32.f32 %v554_v32  ;;  %v411_v8 = vadd.s32 %v410_v6, %v408_v37  ;;  %v583_v55 = vcvt.s32.f32 %v556_v50 }
 0x1dd   : > { %v437_v40 = vpop.xlane.xlu1 %436  ;;  %v422_v23 = vpop.xlane.xlu0 %421  ;;  %v515_v62 = vshll.u32 %v514_v18, 16  ;;  %v529_v29 = vcvt.f32.s32 %v1252_v1  ;;  %v544_v6 = vcvt.f32.s32 %v1259_v52  ;;  %vm659_vm6 = vcmp.eq.s32.totalorder %v1023_v33, 0 }
 0x1de   : > { %597 = vxpose.xlu0.b32.cont [3/16] (narrow) %v581_v30, 8  ;;  %vm557_vm8 = vcmp.lt.s32.totalorder %v396_v5, 31  ;;  %v423_v11 = vcvt.f32.s32 %v422_v23  ;;  %vm559_vm9 = vcmp.lt.s32.totalorder %v411_v8, 31  ;;  %v438_v59 = vcvt.f32.s32 %v437_v40 }
 0x1df   : > { %v558_v16 = vsel %vm557_vm8, %v396_v5, 31  ;;  %v560_v48 = vsel %vm559_vm9, %v411_v8, 31  ;;  %v530_v23 = vshll.u32 %v529_v29, 16  ;;  %v545_v8 = vshll.u32 %v544_v6, 16 }
 0x1e0   : > { %v426_v39 = vadd.s32 %v425_v15, %v423_v11  ;;  %v584_v22 = vcvt.s32.f32 %v558_v16  ;;  %v441_v57 = vadd.s32 %v440_v60, %v438_v59  ;;  %v585_v20 = vcvt.s32.f32 %v560_v48 }
 0x1e1   : > { %v467_v53 = vpop.xlane.xlu1 %466  ;;  %v452_v46 = vpop.xlane.xlu0 %451 }
 0x1e2   : > { %598 = vxpose.xlu0.b32.cont [4/16] (narrow) %v582_v43, 8  ;;  %vm561_vm10 = vcmp.lt.s32.totalorder %v426_v39, 31  ;;  %v453_v51 = vcvt.f32.s32 %v452_v46  ;;  %vm563_vm11 = vcmp.lt.s32.totalorder %v441_v57, 31  ;;  %v468_v58 = vcvt.f32.s32 %v467_v53 }
 0x1e3   : > { %v562_v21 = vsel %vm561_vm10, %v426_v39, 31  ;;  %v564_v42 = vsel %vm563_vm11, %v441_v57, 31  ;;  %v654_v57 = vstv %s653_s6 }
 0x1e4   : > { %v456_v3 = vadd.s32 %v455_v56, %v453_v51  ;;  %v586_v36 = vcvt.s32.f32 %v562_v21  ;;  %v471_v10 = vadd.s32 %v470_v9, %v468_v58  ;;  %v587_v12 = vcvt.s32.f32 %v564_v42 }
 0x1e5   : > { %v497_v19 = vpop.xlane.xlu1 %496  ;;  %v482_v24 = vpop.xlane.xlu0 %481  ;;  %vm655_vm5 = vcmp.eq.s32.totalorder %v654_v57, 1 }
 0x1e6   : > { %599 = vxpose.xlu0.b32.cont [5/16] (narrow) %v583_v55, 8  ;;  %vm565_vm12 = vcmp.lt.s32.totalorder %v456_v3, 31  ;;  %v483_v4 = vcvt.f32.s32 %v482_v24  ;;  %vm567_vm14 = vcmp.lt.s32.totalorder %v471_v10, 31  ;;  %v498_v49 = vcvt.f32.s32 %v497_v19 }
 0x1e7   : > { %v566_v44 = vsel %vm565_vm12, %v456_v3, 31  ;;  %v568_v26 = vsel %vm567_vm14, %v471_v10, 31 }
 0x1e8   : > { %v486_v45 = vadd.s32 %v485_v47, %v483_v4  ;;  %v588_v17 = vcvt.s32.f32 %v566_v44  ;;  %v501_v54 = vadd.s32 %v500_v27, %v498_v49  ;;  %v589_v30 = vcvt.s32.f32 %v568_v26 }
 0x1e9   : > { %v527_v0 = vpop.xlane.xlu1 %526  ;;  %v512_v14 = vpop.xlane.xlu0 %511 }
 0x1ea   : > { %600 = vxpose.xlu0.b32.cont [6/16] (narrow) %v584_v22, 8  ;;  %vm569_vm15 = vcmp.lt.s32.totalorder %v486_v45, 31  ;;  %vm571_vm1 = vcmp.lt.s32.totalorder %v501_v54, 31  ;;  %v528_v32 = vcvt.f32.s32 %v527_v0 }
 0x1eb   : > { %v570_v40 = vsel %vm569_vm15, %v486_v45, 31  ;;  %v572_v41 = vsel %vm571_vm1, %v501_v54, 31 }
 0x1ec   : > { %v590_v63 = vcvt.s32.f32 %v570_v40  ;;  %v531_v43 = vadd.s32 %v530_v23, %v528_v32  ;;  %v591_v11 = vcvt.s32.f32 %v572_v41 }
 0x1ed   : > { %v542_v5 = vpop.xlane.xlu0 %541 }
 0x1ee   : > { %601 = vxpose.xlu0.b32.cont [7/16] (narrow) %v585_v20, 8  ;;  %v543_v50 = vcvt.f32.s32 %v542_v5  ;;  %vm575_vm3 = vcmp.lt.s32.totalorder %v531_v43, 31 }
 0x1ef   : > { %v576_v31 = vsel %vm575_vm3, %v531_v43, 31 }
 0x1f0   : > { %v546_v1 = vadd.s32 %v545_v8, %v543_v50  ;;  %v593_v55 = vcvt.s32.f32 %v576_v31 }
 0x1f2   : > { %v1285_v13 = vpop.xlane.xlu1 %640  ;;  %602 = vxpose.xlu0.b32.cont [8/16] (narrow) %v586_v36, 8  ;;  %vm577_vm0 = vcmp.lt.s32.totalorder %v546_v1, 31 }
 0x1f3   : > { %vm642_vm13 = vcmp.eq.f32.partialorder %v1269_v38, %v1285_v13  ;;  %v513_v38 = vcvt.f32.s32 %v512_v14  ;;  %v578_v16 = vsel %vm577_vm0, %v546_v1, 31  ;;  %v647_v34 = vcvt.f32.s32 %v1285_v13 }
 0x1f4   : > { %v643_v28 = vsel %vm642_vm13, %v638_v25, inf  ;;  %v594_v52 = vcvt.s32.f32 %v578_v16 }
 0x1f5   : > { %644 = vmin.xlane.f32.xlu1 %v643_v28  ;;  %v516_v37 = vadd.s32 %v515_v62, %v513_v38  ;;  %v648_v22 = vshll.u32 %v647_v34, 16 }
 0x1f6   : > { %603 = vxpose.xlu0.b32.cont [9/16] (narrow) %v587_v12, 8 }
 0x1f7   : > { %vm573_vm2 = vcmp.lt.s32.totalorder %v516_v37, 31 }
 0x1f8   : > { %v574_v53 = vsel %vm573_vm2, %v516_v37, 31 }
 0x1f9   : > { %v592_v15 = vcvt.s32.f32 %v574_v53 }
 0x1fa   : > { %604 = vxpose.xlu0.b32.cont [10/16] (narrow) %v588_v17, 8 }
 0x1fe   : > { %605 = vxpose.xlu0.b32.cont [11/16] (narrow) %v589_v30, 8 }
 0x202   : > { %606 = vxpose.xlu0.b32.cont [12/16] (narrow) %v590_v63, 8 }
 0x206   : > { %607 = vxpose.xlu0.b32.cont [13/16] (narrow) %v591_v11, 8 }
 0x20a   : > { %608 = vxpose.xlu0.b32.cont [14/16] (narrow) %v592_v15, 8 }
 0x20e   : > { %609 = vxpose.xlu0.b32.cont [15/16] (narrow) %v593_v55, 8 }
 0x212   : > { %610 = vxpose.xlu0.b32.end [16/16] (narrow) %v594_v52, 8 }
 0x256   : > { %v611_v59 = vpop.trf.xlu0 }
 0x257   : > { %v771_v39 = vtrunc.f32 %v611_v59 }
 0x259   : > { %v772_v46 = vcvt.f32.s32 %v771_v39 }
 0x25b   : > { %657 = vrot.lane.b32.xlu1 %v772_v46, %s877_s5  ;;  %vm662_vm8 = vcmp.ne.s32.totalorder %v772_v46, 0 }
 0x282   : > { %v645_v60 = vpop.xlane.xlu1 %644 }
 0x283   : > { %v646_v19 = vcvt.f32.s32 %v645_v60 }
 0x285   : > { %v649_v48 = vadd.s32 %v648_v22, %v646_v19 }
 0x287   : > { %vm650_vm4 = vcmp.lt.s32.totalorder %v649_v48, 31 }
 0x288   : > { %v651_v51 = vsel %vm650_vm4, %v649_v48, 31 }
 0x289   : > { %v656_v56 = vsel %vm655_vm5, 4294967295, %v651_v51 }
 0x2cd   : > { %v658_v35 = vpop.permute.xlu1 %657 }
 0x2ce   : > { %v660_v20 = vsel %vm659_vm6, %v656_v56, %v658_v35 }
 0x2cf   : > { %vm661_vm7 = vcmp.ne.s32.totalorder %v772_v46, %v660_v20 }
 0x2d0   : > { %vm663_vm9 = vmand %vm661_vm7, %vm662_vm8 }
 0x2d1   : > { %v664_v33 = vsel %vm663_vm9, %v772_v46, 4294967295 }
 0x2d2   : > { %665 = vst [vmem:[%s181_s8] sm:$0x1] %v664_v33 }
 0x2d3   : > { %826 = shalt.err (!%p823_p8)
}
 0x2d4   : > { %s827_s21 = scalar_lea.hbm %s1301_s17, 16  ;;  %s831_s29 = scalar_lea.hbm %s1345_s2, 32 }
 0x2d5   : > { %p828_p9 = scmp.ne.s32.totalorder %s1301_s17, %s827_s21  ;;  %p832_p12 = scmp.lt.u32.totalorder %s1301_s17, %s1345_s2 }
 0x2d6   : > { %p833_p13 = scmp.lt.u32.totalorder %s831_s29, %s827_s21  ;;  %p835_p1 = scmp.lt.u32.totalorder %s827_s21, %s1301_s17 }
 0x2d7   : > { %p829_p10 = pnand %p828_p9, %p932_p5 }
 0x2d8   : > { %p834_p0 = por %p833_p13, %p832_p12 }
 0x2d9   : > { %p830_p11 = pneg %p829_p10 }
 0x2da   : > { %p836_p2 = por %p835_p1, %p834_p0 }
 0x2dc   : > { %p837_p3 = pnand %p836_p2, %p830_p11 }
 0x2de   : > { %840 = shalt.err (!%p837_p3)
}
 0x2df   : > { %773 = dma.vmem_to_hbm [thread:$0]  (%p932_p5), %s1303_s14, 16, %s1301_s17, %s667_s22  }
 0x2e0 PF: > { %p779_p4 = scmp.ge.s32.totalorder %s875_s12, 2  ;;  %s691_s4 = sand.u32 1, %s863_s9  }
 0x2e1   : > { %s692_s5 = scalar_lea.sflag [#allocation3], %s691_s4 }
 0x2e2   : > { %p776_p7 = pnand %p779_p4, %p936_p6 }
 0x2e4   : > { %858 = dma.done.wait (!%p776_p7), %s692_s5, 16  }
 0x2e5   : > { %860 = vsyncadd (!%p776_p7), %s692_s5, 4294967280  ;;  %p12_p8 = scmp.ge.s32.totalorder %s919_s15, 4   ;;  %s1348_s9 = smov %s867_s10 }
 0x2e6   : > { %s1349_s10 = smov %s871_s11  ;;  %s1350_s11 = smov %s930_s18 }
 0x2e7   : > { %s1351_s12 = smov %s919_s15  ;;  %14 = sbr.rel (!%p12_p8) target bundleno = 3 (0x3), region = 66 }
 0x2ee   :  { %696 = vsyncpa [#allocation3], 1 }
 0x2ef   :  { %698 = vsyncpa [#allocation3 + $0x1], 1 }

</bundles_post_ra>
